<compile_context>
chip_gen: v7x
topology: tpu7x:2x2x1
jax: 0.10.0
libtpu: 0.0.40
codegen_flags: <defaults>
</compile_context>

<pallas_src>
import functools

import jax
import jax.numpy as jnp
from jax.experimental import pallas as pl
from jax.experimental.pallas import tpu as pltpu


LN_EPS = 1e-5


def _mlffn_kernel(x_ref, w_ref, b_ref, g_ref, beta_ref, seg_ref, o_ref,
                  *, layer_flags, inv_d):
    # x_ref:    (tm, 128)            lane-packed input tile (pack rows of D per vreg row)
    # w_ref:    (L, 128, 128)        block-diagonal W^T per layer (f32, pre-cast)
    # b_ref:    (L, 1, 128)          lane-tiled linear bias per layer
    # g_ref:    (L, 1, 128)          lane-tiled LayerNorm gamma per layer
    # beta_ref: (L, 1, 128)          lane-tiled LayerNorm beta per layer
    # seg_ref:  (128, 128)           block-diag ones matrix -> per-32-lane-segment sum
    # layer_flags: static tuple of (use_layernorm, use_skip) per layer
    h = x_ref[...].astype(jnp.float32)
    seg = seg_ref[...]

    for l, (use_ln, use_skip) in enumerate(layer_flags):
        # Linear (MXU); block-diag weight keeps the 4 packed rows independent.
        y = jnp.dot(h, w_ref[l], preferred_element_type=jnp.float32)
        y = y + b_ref[l]

        # Activation: sigmoid = 1 / (1 + exp(-y))  (exp on EUP, reciprocal exact)
        y = pl.reciprocal(1.0 + jnp.exp(-y), approx=False)

        if use_skip:                       # skip_connection (dims are equal)
            y = y + h

        if use_ln:
            # Segmented LayerNorm over each logical row of D lanes, done with the
            # block-diagonal segment-sum matrix on the (idle) MXU.
            mean = jnp.dot(y, seg, preferred_element_type=jnp.float32) * inv_d
            c = y - mean
            var = jnp.dot(c * c, seg, preferred_element_type=jnp.float32) * inv_d
            y = c * jax.lax.rsqrt(var + LN_EPS)
            y = y * g_ref[l] + beta_ref[l]

        h = y

    o_ref[...] = h.astype(o_ref.dtype)


def _round_up(x, m):
    return ((x + m - 1) // m) * m


@functools.partial(jax.jit, static_argnames=("layer_flags", "tm"))
def multilayer_ffn_forward(x, w_stack, b_stack, g_stack, beta_stack,
                           *, layer_flags, tm=512):
    """Fused MultiLayerFeedForwardNN forward.

    x:          [batch, seq, D]
    w_stack:    [L, D, D]  transposed weights (y = x @ w)
    b_stack:    [L, D]     linear biases
    g_stack:    [L, D]     LayerNorm gammas (ignored for layers without LN)
    beta_stack: [L, D]     LayerNorm betas  (ignored for layers without LN)
    layer_flags: static tuple of (use_layernorm, use_skip) per layer
    tm:          packed-row tile size (multiple of 8)
    """
    batch, seq, d = x.shape
    num_layers = w_stack.shape[0]
    assert len(layer_flags) == num_layers
    # TODO(synk): fused packed kernel assumes every layer is D->D; mismatched
    # hidden/output dims would need per-layer repacking.
    assert w_stack.shape == (num_layers, d, d)
    assert 128 % d == 0 and d <= 128
    assert tm % 8 == 0

    f32 = jnp.float32
    pack = 128 // d
    lanes = pack * d                       # 128
    m = batch * seq

    # ---- lane-dense packing: `pack` logical rows per 128-lane vreg row ----
    rows = -(-m // pack)                             # ceil(m / pack)
    tm_eff = min(tm, _round_up(rows, 8))
    rows_padded = _round_up(rows, tm_eff)
    m_padded = rows_padded * pack

    x2 = x.reshape(m, d)
    x2 = jnp.pad(x2, ((0, m_padded - m), (0, 0)))
    xp = x2.reshape(rows_padded, lanes)

    # ---- grid-invariant params: pre-cast + pre-laid-out (hoisted out of kernel) ----
    eye = jnp.eye(pack, dtype=f32)
    w_blocks = jax.vmap(lambda w: jnp.kron(eye, w))(w_stack.astype(f32))     # [L,128,128]
    b_t = jnp.tile(b_stack.astype(f32), (1, pack)).reshape(num_layers, 1, lanes)
    g_t = jnp.tile(g_stack.astype(f32), (1, pack)).reshape(num_layers, 1, lanes)
    beta_t = jnp.tile(beta_stack.astype(f32), (1, pack)).reshape(num_layers, 1, lanes)
    seg = jnp.kron(eye, jnp.ones((d, d), dtype=f32))                          # [128,128]

    grid = (rows_padded // tm_eff,)

    n_ln = sum(1 for ln, _ in layer_flags if ln)
    flops = (num_layers * 2 * m_padded * d * d
             + n_ln * 4 * rows_padded * lanes * lanes)
    transcendentals = num_layers * m_padded * d
    bytes_accessed = (2 * m_padded * d * 4
                      + num_layers * (lanes * lanes + 3 * lanes) * 4
                      + lanes * lanes * 4)

    kernel = functools.partial(_mlffn_kernel,
                               layer_flags=tuple(layer_flags),
                               inv_d=1.0 / d)

    outp = pl.pallas_call(
        kernel,
        out_shape=jax.ShapeDtypeStruct((rows_padded, lanes), x.dtype),
        grid_spec=pltpu.PrefetchScalarGridSpec(
            num_scalar_prefetch=0,
            grid=grid,
            in_specs=[
                pl.BlockSpec((tm_eff, lanes), lambda i: (i, 0)),
                pl.BlockSpec((num_layers, lanes, lanes), lambda i: (0, 0, 0)),
                pl.BlockSpec((num_layers, 1, lanes), lambda i: (0, 0, 0)),
                pl.BlockSpec((num_layers, 1, lanes), lambda i: (0, 0, 0)),
                pl.BlockSpec((num_layers, 1, lanes), lambda i: (0, 0, 0)),
                pl.BlockSpec((lanes, lanes), lambda i: (0, 0)),
            ],
            out_specs=pl.BlockSpec((tm_eff, lanes), lambda i: (i, 0)),
        ),
        compiler_params=pltpu.CompilerParams(
            dimension_semantics=("parallel",)),
        cost_estimate=pl.CostEstimate(
            flops=flops,
            transcendentals=transcendentals,
            bytes_accessed=bytes_accessed),
    )(xp, w_blocks, b_t, g_t, beta_t, seg)

    out2 = outp.reshape(m_padded, d)[:m]
    return out2.reshape(batch, seq, d)


def _reference(x, w_stack, b_stack, g_stack, beta_stack, layer_flags):
    h = x
    for l, (use_ln, use_skip) in enumerate(layer_flags):
        y = jnp.einsum("...i,io->...o", h, w_stack[l]) + b_stack[l]
        y = jax.nn.sigmoid(y)
        if use_skip:
            y = y + h
        if use_ln:
            mean = jnp.mean(y, axis=-1, keepdims=True)
            var = jnp.mean((y - mean) ** 2, axis=-1, keepdims=True)
            y = (y - mean) / jnp.sqrt(var + LN_EPS)
            y = y * g_stack[l] + beta_stack[l]
        h = y
    return h


if __name__ == "__main__":
    # MultiLayerFeedForwardNN(input_dim=32, output_dim=32, num_hidden_layers=1,
    #                         dropout_rate=None, hidden_dim=32, activation='sigmoid',
    #                         use_layernormalize=True, skip_connection=True)
    # -> layer 0: Linear(32,32) + sigmoid + skip + LayerNorm
    #    layer 1: Linear(32,32) + sigmoid   (output layer: no LN / no skip)
    d = 32
    batch, seq = 2, 8
    num_layers = 2
    layer_flags = ((True, True), (False, False))

    key = jax.random.PRNGKey(0)
    k_x, *k_layers = jax.random.split(key, 1 + 2 * num_layers)

    x = jax.random.normal(k_x, (batch, seq, d), dtype=jnp.float32)

    # PyTorch inits: xavier-uniform weight [out,in], bias U(-1/sqrt(fan_in), +),
    # LayerNorm gamma=1 / beta=0.
    bound_w = (6.0 / (d + d)) ** 0.5
    bound_b = 1.0 / (d ** 0.5)

    w_list, b_list, g_list, beta_list = [], [], [], []
    for l in range(num_layers):
        kw, kb = k_layers[2 * l], k_layers[2 * l + 1]
        w = jax.random.uniform(kw, (d, d), minval=-bound_w, maxval=bound_w,
                               dtype=jnp.float32)          # [out, in]
        w_list.append(w.T)                                  # [in, out]
        b_list.append(jax.random.uniform(kb, (d,), minval=-bound_b,
                                         maxval=bound_b, dtype=jnp.float32))
        g_list.append(jnp.ones((d,), jnp.float32))
        beta_list.append(jnp.zeros((d,), jnp.float32))

    w_stack = jnp.stack(w_list)
    b_stack = jnp.stack(b_list)
    g_stack = jnp.stack(g_list)
    beta_stack = jnp.stack(beta_list)

    out = multilayer_ffn_forward(x, w_stack, b_stack, g_stack, beta_stack,
                                 layer_flags=layer_flags)
    out = jax.block_until_ready(out)

    ref = _reference(x, w_stack, b_stack, g_stack, beta_stack, layer_flags)
    assert out.shape == (batch, seq, d)
    assert jnp.allclose(out, ref, atol=2e-5, rtol=2e-5)

    print("KERNEL_OK")
</pallas_src>

<mosaic_0001>
module attributes {stable_mosaic.version = 11 : i64} {
  func.func @_mlffn_kernel(%arg0: i32, %arg1: memref<8x128xf32, #tpu.memory_space<vmem>>, %arg2: memref<2x128x128xf32, #tpu.memory_space<vmem>>, %arg3: memref<2x1x128xf32, #tpu.memory_space<vmem>>, %arg4: memref<2x1x128xf32, #tpu.memory_space<vmem>>, %arg5: memref<2x1x128xf32, #tpu.memory_space<vmem>>, %arg6: memref<128x128xf32, #tpu.memory_space<vmem>>, %arg7: memref<8x128xf32, #tpu.memory_space<vmem>>) attributes {dimension_semantics = [#tpu.dimension_semantics<parallel>], iteration_bounds = array<i64: 1>, scalar_prefetch = 0 : i64, scratch_operands = 0 : i64, tpu.core_type = #tpu.core_type<tc>, window_params = [{transform_indices = @transform_0, window_bounds = array<i64: 8, 128>}, {pipeline_mode = #tpu.pipeline_mode<synchronous>, transform_indices = @transform_1, window_bounds = array<i64: 2, 128, 128>}, {pipeline_mode = #tpu.pipeline_mode<synchronous>, transform_indices = @transform_2, window_bounds = array<i64: 2, 1, 128>}, {pipeline_mode = #tpu.pipeline_mode<synchronous>, transform_indices = @transform_3, window_bounds = array<i64: 2, 1, 128>}, {pipeline_mode = #tpu.pipeline_mode<synchronous>, transform_indices = @transform_4, window_bounds = array<i64: 2, 1, 128>}, {pipeline_mode = #tpu.pipeline_mode<synchronous>, transform_indices = @transform_5, window_bounds = array<i64: 128, 128>}, {transform_indices = @transform_6, window_bounds = array<i64: 8, 128>}]} {
    %c0 = arith.constant 0 : index
    %c0_0 = arith.constant 0 : index
    %0 = vector.load %arg1[%c0, %c0_0] : memref<8x128xf32, #tpu.memory_space<vmem>>, vector<8x128xf32>
    %c0_1 = arith.constant 0 : index
    %c0_2 = arith.constant 0 : index
    %1 = vector.load %arg6[%c0_1, %c0_2] : memref<128x128xf32, #tpu.memory_space<vmem>>, vector<128x128xf32>
    %c0_3 = arith.constant 0 : index
    %c0_4 = arith.constant 0 : index
    %c0_5 = arith.constant 0 : index
    %2 = vector.load %arg2[%c0_3, %c0_4, %c0_5] : memref<2x128x128xf32, #tpu.memory_space<vmem>>, vector<1x128x128xf32>
    %3 = vector.shape_cast %2 : vector<1x128x128xf32> to vector<128x128xf32>
    %cst = arith.constant dense<0.000000e+00> : vector<8x128xf32>
    %4 = tpu.matmul %0, %3, %cst {dimension_numbers = #tpu.dot_dimension_numbers<[1], [0], [0], [1], [0, 0, 1, 1], [], []>} : vector<8x128xf32>, vector<128x128xf32>, vector<8x128xf32> -> vector<8x128xf32>
    %c0_6 = arith.constant 0 : index
    %c0_7 = arith.constant 0 : index
    %c0_8 = arith.constant 0 : index
    %5 = vector.load %arg3[%c0_6, %c0_7, %c0_8] : memref<2x1x128xf32, #tpu.memory_space<vmem>>, vector<1x1x128xf32>
    %6 = vector.shape_cast %5 : vector<1x1x128xf32> to vector<1x128xf32>
    %7 = vector.broadcast %6 : vector<1x128xf32> to vector<8x128xf32>
    %8 = arith.addf %4, %7 : vector<8x128xf32>
    %cst_9 = arith.constant 0.000000e+00 : f32
    %9 = vector.broadcast %cst_9 : f32 to vector<8x128xf32>
    %10 = arith.subf %9, %8 : vector<8x128xf32>
    %11 = math.exp %10 : vector<8x128xf32>
    %cst_10 = arith.constant 1.000000e+00 : f32
    %12 = vector.broadcast %cst_10 : f32 to vector<8x128xf32>
    %13 = arith.addf %12, %11 : vector<8x128xf32>
    %14 = tpu.reciprocal %13 : vector<8x128xf32> -> vector<8x128xf32>
    %15 = arith.addf %14, %0 : vector<8x128xf32>
    %cst_11 = arith.constant dense<0.000000e+00> : vector<8x128xf32>
    %16 = tpu.matmul %15, %1, %cst_11 {dimension_numbers = #tpu.dot_dimension_numbers<[1], [0], [0], [1], [0, 0, 1, 1], [], []>} : vector<8x128xf32>, vector<128x128xf32>, vector<8x128xf32> -> vector<8x128xf32>
    %cst_12 = arith.constant 3.125000e-02 : f32
    %17 = vector.broadcast %cst_12 : f32 to vector<8x128xf32>
    %18 = arith.mulf %16, %17 : vector<8x128xf32>
    %19 = arith.subf %15, %18 : vector<8x128xf32>
    %20 = arith.mulf %19, %19 : vector<8x128xf32>
    %cst_13 = arith.constant dense<0.000000e+00> : vector<8x128xf32>
    %21 = tpu.matmul %20, %1, %cst_13 {dimension_numbers = #tpu.dot_dimension_numbers<[1], [0], [0], [1], [0, 0, 1, 1], [], []>} : vector<8x128xf32>, vector<128x128xf32>, vector<8x128xf32> -> vector<8x128xf32>
    %cst_14 = arith.constant 3.125000e-02 : f32
    %22 = vector.broadcast %cst_14 : f32 to vector<8x128xf32>
    %23 = arith.mulf %21, %22 : vector<8x128xf32>
    %cst_15 = arith.constant 9.99999974E-6 : f32
    %24 = vector.broadcast %cst_15 : f32 to vector<8x128xf32>
    %25 = arith.addf %23, %24 : vector<8x128xf32>
    %26 = math.rsqrt %25 : vector<8x128xf32>
    %27 = arith.mulf %19, %26 : vector<8x128xf32>
    %c0_16 = arith.constant 0 : index
    %c0_17 = arith.constant 0 : index
    %c0_18 = arith.constant 0 : index
    %28 = vector.load %arg4[%c0_16, %c0_17, %c0_18] : memref<2x1x128xf32, #tpu.memory_space<vmem>>, vector<1x1x128xf32>
    %29 = vector.shape_cast %28 : vector<1x1x128xf32> to vector<1x128xf32>
    %30 = vector.broadcast %29 : vector<1x128xf32> to vector<8x128xf32>
    %31 = arith.mulf %27, %30 : vector<8x128xf32>
    %c0_19 = arith.constant 0 : index
    %c0_20 = arith.constant 0 : index
    %c0_21 = arith.constant 0 : index
    %32 = vector.load %arg5[%c0_19, %c0_20, %c0_21] : memref<2x1x128xf32, #tpu.memory_space<vmem>>, vector<1x1x128xf32>
    %33 = vector.shape_cast %32 : vector<1x1x128xf32> to vector<1x128xf32>
    %34 = vector.broadcast %33 : vector<1x128xf32> to vector<8x128xf32>
    %35 = arith.addf %31, %34 : vector<8x128xf32>
    %c1 = arith.constant 1 : index
    %c0_22 = arith.constant 0 : index
    %c0_23 = arith.constant 0 : index
    %36 = vector.load %arg2[%c1, %c0_22, %c0_23] : memref<2x128x128xf32, #tpu.memory_space<vmem>>, vector<1x128x128xf32>
    %37 = vector.shape_cast %36 : vector<1x128x128xf32> to vector<128x128xf32>
    %cst_24 = arith.constant dense<0.000000e+00> : vector<8x128xf32>
    %38 = tpu.matmul %35, %37, %cst_24 {dimension_numbers = #tpu.dot_dimension_numbers<[1], [0], [0], [1], [0, 0, 1, 1], [], []>} : vector<8x128xf32>, vector<128x128xf32>, vector<8x128xf32> -> vector<8x128xf32>
    %c1_25 = arith.constant 1 : index
    %c0_26 = arith.constant 0 : index
    %c0_27 = arith.constant 0 : index
    %39 = vector.load %arg3[%c1_25, %c0_26, %c0_27] : memref<2x1x128xf32, #tpu.memory_space<vmem>>, vector<1x1x128xf32>
    %40 = vector.shape_cast %39 : vector<1x1x128xf32> to vector<1x128xf32>
    %41 = vector.broadcast %40 : vector<1x128xf32> to vector<8x128xf32>
    %42 = arith.addf %38, %41 : vector<8x128xf32>
    %cst_28 = arith.constant 0.000000e+00 : f32
    %43 = vector.broadcast %cst_28 : f32 to vector<8x128xf32>
    %44 = arith.subf %43, %42 : vector<8x128xf32>
    %45 = math.exp %44 : vector<8x128xf32>
    %cst_29 = arith.constant 1.000000e+00 : f32
    %46 = vector.broadcast %cst_29 : f32 to vector<8x128xf32>
    %47 = arith.addf %46, %45 : vector<8x128xf32>
    %48 = tpu.reciprocal %47 : vector<8x128xf32> -> vector<8x128xf32>
    %c0_30 = arith.constant 0 : index
    %c0_31 = arith.constant 0 : index
    %49 = vector.load %arg7[%c0_30, %c0_31] : memref<8x128xf32, #tpu.memory_space<vmem>>, vector<8x128xf32>
    tpu.vector_store %arg7[%c0_30, %c0_31], %48 {strides = array<i32>} : memref<8x128xf32, #tpu.memory_space<vmem>>, vector<8x128xf32>,
    return
  }
  func.func @transform_0(%arg0: i32) -> (i32, i32) {
    %c0_i32 = arith.constant 0 : i32
    %c0_i32_0 = arith.constant 0 : i32
    return %arg0, %c0_i32 : i32, i32
  }
  func.func @transform_1(%arg0: i32) -> (i32, i32, i32) {
    %c0_i32 = arith.constant 0 : i32
    %c0_i32_0 = arith.constant 0 : i32
    %c0_i32_1 = arith.constant 0 : i32
    %c0_i32_2 = arith.constant 0 : i32
    return %c0_i32, %c0_i32_0, %c0_i32_1 : i32, i32, i32
  }
  func.func @transform_2(%arg0: i32) -> (i32, i32, i32) {
    %c0_i32 = arith.constant 0 : i32
    %c0_i32_0 = arith.constant 0 : i32
    %c0_i32_1 = arith.constant 0 : i32
    %c0_i32_2 = arith.constant 0 : i32
    return %c0_i32, %c0_i32_0, %c0_i32_1 : i32, i32, i32
  }
  func.func @transform_3(%arg0: i32) -> (i32, i32, i32) {
    %c0_i32 = arith.constant 0 : i32
    %c0_i32_0 = arith.constant 0 : i32
    %c0_i32_1 = arith.constant 0 : i32
    %c0_i32_2 = arith.constant 0 : i32
    return %c0_i32, %c0_i32_0, %c0_i32_1 : i32, i32, i32
  }
  func.func @transform_4(%arg0: i32) -> (i32, i32, i32) {
    %c0_i32 = arith.constant 0 : i32
    %c0_i32_0 = arith.constant 0 : i32
    %c0_i32_1 = arith.constant 0 : i32
    %c0_i32_2 = arith.constant 0 : i32
    return %c0_i32, %c0_i32_0, %c0_i32_1 : i32, i32, i32
  }
  func.func @transform_5(%arg0: i32) -> (i32, i32) {
    %c0_i32 = arith.constant 0 : i32
    %c0_i32_0 = arith.constant 0 : i32
    %c0_i32_1 = arith.constant 0 : i32
    return %c0_i32, %c0_i32_0 : i32, i32
  }
  func.func @transform_6(%arg0: i32) -> (i32, i32) {
    %c0_i32 = arith.constant 0 : i32
    %c0_i32_0 = arith.constant 0 : i32
    return %arg0, %c0_i32 : i32, i32
  }
}

</mosaic_0001>

<bundles_post_ra>
// kernel: multilayer_ffn_forward.1
= control target key start
LH: loop header
LB: loop body
LE: loop exit
PB: predicated region body
PF: predicated region fallthrough
CT: control target
= control target key end

     0   :  { %v745_v0 = vmov 0.0|0.0   ;;  %vm746_vm0 = vmmov 0   ;;  %v747_v4 = vmov 0.0   ;;  %s989_s1 = inlined_call_operand.vmem [shape: f32[2,128,128], index: 1, kind: input, shape index: {}]   ;;  %s990_s0 = inlined_call_operand.vmem [shape: f32[8,128], index: 0, kind: input, shape index: {}]   ;;  %s991_s5 = inlined_call_operand.vmem [shape: f32[128,128], index: 5, kind: input, shape index: {}]   ;;  %s992_s2 = inlined_call_operand.vmem [shape: f32[2,1,128], index: 2, kind: input, shape index: {}]   ;;  %s993_s3 = inlined_call_operand.vmem [shape: f32[2,1,128], index: 3, kind: input, shape index: {}]   ;;  %s994_s4 = inlined_call_operand.vmem [shape: f32[2,1,128], index: 4, kind: input, shape index: {}]   ;;  %s995_s6 = inlined_call_operand.vmem [shape: f32[8,128], index: 6, kind: output, shape index: {}]  }
   0x1   :  { %636 = vmatprep.subr.bf16.mxu0 %v745_v0  ;;  %v40_v1 = vld [vmem:[%s989_s1] sm:$0xff]  ;;  %v41_v2 = vld [vmem:[%s989_s1 + $0x8] sm:$0xff]  ;;  %v42_v3 = vld [vmem:[%s989_s1 + $0x10] sm:$0xff]  ;;  %528 = vmatprep.mubr.msk.f32.mxu0 %vm746_vm0, %v747_v4 }
   0x2   :  { %v637_v5 = vpack.c.bf16 %v41_v2, %v40_v1  ;;  %v43_v6 = vld [vmem:[%s989_s1 + $0x18] sm:$0xff]  ;;  %660 = vmatprep.subr.bf16.mxu1 %v745_v0  ;;  %563 = vmatprep.mubr.msk.f32.mxu1 %vm746_vm0, %v747_v4  ;;  %v44_v8 = vld [vmem:[%s989_s1 + $0x20] sm:$0xff]  ;;  %v45_v9 = vld [vmem:[%s989_s1 + $0x28] sm:$0xff] }
   0x3   :  { %v640_v7 = vpack.c.bf16 %v43_v6, %v42_v3  ;;  %v643_v10 = vpack.c.bf16 %v45_v9, %v44_v8  ;;  %v46_v11 = vld [vmem:[%s989_s1 + $0x30] sm:$0xff]  ;;  %v47_v12 = vld [vmem:[%s989_s1 + $0x38] sm:$0xff]  ;;  %v48_v14 = vld [vmem:[%s989_s1 + $0x40] sm:$0xff] }
   0x4   :  { %638 = vmatpush3.bf16.msra.mxu0 %v637_v5  ;;  %v646_v13 = vpack.c.bf16 %v47_v12, %v46_v11  ;;  %v49_v15 = vld [vmem:[%s989_s1 + $0x48] sm:$0xff]  ;;  %v50_v17 = vld [vmem:[%s989_s1 + $0x50] sm:$0xff]  ;;  %v51_v18 = vld [vmem:[%s989_s1 + $0x58] sm:$0xff] }
   0x5   :  { %639 = vmatprep.subr.bf16.mxu0 %v745_v0  ;;  %v649_v16 = vpack.c.bf16 %v49_v15, %v48_v14  ;;  %v652_v19 = vpack.c.bf16 %v51_v18, %v50_v17  ;;  %v52_v20 = vld [vmem:[%s989_s1 + $0x60] sm:$0xff]  ;;  %v53_v21 = vld [vmem:[%s989_s1 + $0x68] sm:$0xff]  ;;  %v54_v23 = vld [vmem:[%s989_s1 + $0x70] sm:$0xff] }
   0x6   :  { %v655_v22 = vpack.c.bf16 %v53_v21, %v52_v20  ;;  %v55_v24 = vld [vmem:[%s989_s1 + $0x78] sm:$0xff]  ;;  %v847_v26 = vld [vmem:[%s990_s0] sm:$0xff]  ;;  %v25_v28 = vld [vmem:[%s991_s5 + $0x8] sm:$0xff] }
   0x7   :  { %v658_v25 = vpack.c.bf16 %v55_v24, %v54_v23  ;;  %v24_v27 = vld [vmem:[%s991_s5] sm:$0xff]  ;;  %v26_v30 = vld [vmem:[%s991_s5 + $0x10] sm:$0xff]  ;;  %v27_v31 = vld [vmem:[%s991_s5 + $0x18] sm:$0xff] }
   0x8   :  { %641 = vmatpush3.bf16.msra.mxu0 %v640_v7  ;;  %v661_v29 = vpack.c.bf16 %v25_v28, %v24_v27  ;;  %v664_v32 = vpack.c.bf16 %v27_v31, %v26_v30  ;;  %v28_v33 = vld [vmem:[%s991_s5 + $0x20] sm:$0xff]  ;;  %v29_v34 = vld [vmem:[%s991_s5 + $0x28] sm:$0xff]  ;;  %v30_v36 = vld [vmem:[%s991_s5 + $0x30] sm:$0xff] }
   0x9   :  { %642 = vmatprep.subr.bf16.mxu0 %v745_v0  ;;  %v667_v35 = vpack.c.bf16 %v29_v34, %v28_v33  ;;  %v31_v37 = vld [vmem:[%s991_s5 + $0x38] sm:$0xff]  ;;  %v32_v39 = vld [vmem:[%s991_s5 + $0x40] sm:$0xff]  ;;  %v33_v40 = vld [vmem:[%s991_s5 + $0x48] sm:$0xff] }
   0xa   :  { %662 = vmatpush3.bf16.msra.mxu1 %v661_v29  ;;  %v670_v38 = vpack.c.bf16 %v31_v37, %v30_v36  ;;  %v673_v41 = vpack.c.bf16 %v33_v40, %v32_v39  ;;  %v34_v42 = vld [vmem:[%s991_s5 + $0x50] sm:$0xff]  ;;  %v35_v43 = vld [vmem:[%s991_s5 + $0x58] sm:$0xff]  ;;  %v36_v45 = vld [vmem:[%s991_s5 + $0x60] sm:$0xff] }
   0xb   :  { %663 = vmatprep.subr.bf16.mxu1 %v745_v0  ;;  %v676_v44 = vpack.c.bf16 %v35_v43, %v34_v42  ;;  %v37_v46 = vld [vmem:[%s991_s5 + $0x68] sm:$0xff]  ;;  %v38_v48 = vld [vmem:[%s991_s5 + $0x70] sm:$0xff]  ;;  %v39_v49 = vld [vmem:[%s991_s5 + $0x78] sm:$0xff] }
   0xc   :  { %644 = vmatpush3.bf16.msra.mxu0 %v643_v10  ;;  %v679_v47 = vpack.c.bf16 %v37_v46, %v36_v45  ;;  %v682_v50 = vpack.c.bf16 %v39_v49, %v38_v48  ;;  %v407_v51 = vld [vmem:[%s992_s2] ss:$0 sm:$0xff]  ;;  %v411_v62 = vld [vmem:[%s989_s1 + $0x88] sm:$0xff]  ;;  %v412_v63 = vld [vmem:[%s989_s1 + $0x90] sm:$0xff] }
   0xd   :  { %645 = vmatprep.subr.bf16.mxu0 %v745_v0  ;;  %v410_v61 = vld [vmem:[%s989_s1 + $0x80] sm:$0xff]  ;;  %v413_v2 = vld [vmem:[%s989_s1 + $0x98] sm:$0xff]  ;;  %v415_v5 = vld [vmem:[%s989_s1 + $0xa8] sm:$0xff] }
   0xe   :  { %665 = vmatpush3.bf16.msra.mxu1 %v664_v32  ;;  %v709_v1 = vpack.c.bf16 %v411_v62, %v410_v61  ;;  %v712_v3 = vpack.c.bf16 %v413_v2, %v412_v63  ;;  %v416_v12 = vld [vmem:[%s989_s1 + $0xb0] sm:$0xff]  ;;  %v418_v15 = vld [vmem:[%s989_s1 + $0xc0] sm:$0xff] }
   0xf   :  { %666 = vmatprep.subr.bf16.mxu1 %v745_v0  ;;  %v420_v18 = vld [vmem:[%s989_s1 + $0xd0] sm:$0xff]  ;;  %v422_v21 = vld [vmem:[%s989_s1 + $0xe0] sm:$0xff] }
  0x10   :  { %647 = vmatpush3.bf16.msra.mxu0 %v646_v13  ;;  %v417_v13 = vld [vmem:[%s989_s1 + $0xb8] sm:$0xff]  ;;  %v424_v24 = vld [vmem:[%s989_s1 + $0xf0] sm:$0xff]  ;;  %v409_v34 = vld [vmem:[%s994_s4] ss:$0 sm:$0xff] }
  0x11   :  { %648 = vmatprep.subr.bf16.mxu0 %v745_v0  ;;  %v718_v14 = vpack.c.bf16 %v417_v13, %v416_v12 }
  0x12   :  { %668 = vmatpush3.bf16.msra.mxu1 %v667_v35 }
  0x13   :  { %669 = vmatprep.subr.bf16.mxu1 %v745_v0 }
  0x14   :  { %650 = vmatpush3.bf16.msra.mxu0 %v649_v16  ;;  %v419_v16 = vld [vmem:[%s989_s1 + $0xc8] sm:$0xff] }
  0x15   :  { %651 = vmatprep.subr.bf16.mxu0 %v745_v0  ;;  %v721_v17 = vpack.c.bf16 %v419_v16, %v418_v15 }
  0x16   :  { %671 = vmatpush3.bf16.msra.mxu1 %v670_v38 }
  0x17   :  { %672 = vmatprep.subr.bf16.mxu1 %v745_v0 }
  0x18   :  { %653 = vmatpush3.bf16.msra.mxu0 %v652_v19  ;;  %v421_v19 = vld [vmem:[%s989_s1 + $0xd8] sm:$0xff] }
  0x19   :  { %654 = vmatprep.subr.bf16.mxu0 %v745_v0  ;;  %v724_v20 = vpack.c.bf16 %v421_v19, %v420_v18 }
  0x1a   :  { %674 = vmatpush3.bf16.msra.mxu1 %v673_v41 }
  0x1b   :  { %675 = vmatprep.subr.bf16.mxu1 %v745_v0 }
  0x1c   :  { %656 = vmatpush3.bf16.msra.mxu0 %v655_v22  ;;  %v423_v22 = vld [vmem:[%s989_s1 + $0xe8] sm:$0xff] }
  0x1d   :  { %657 = vmatprep.subr.bf16.mxu0 %v745_v0  ;;  %v727_v23 = vpack.c.bf16 %v423_v22, %v422_v21 }
  0x1e   :  { %677 = vmatpush3.bf16.msra.mxu1 %v676_v44 }
  0x1f   :  { %678 = vmatprep.subr.bf16.mxu1 %v745_v0 }
  0x20   :  { %659 = vmatpush3.bf16.msra.mxu0 %v658_v25  ;;  %v425_v25 = vld [vmem:[%s989_s1 + $0xf8] sm:$0xff] }
  0x21   :  { %684 = vmatprep.subr.bf16.mxu0 %v745_v0 }
  0x22   :  { %680 = vmatpush3.bf16.msra.mxu1 %v679_v47 }
  0x23   :  { %529 = vmatmul.mubr.f32.vlgmr.msra.gmra.mrb[0].mxu0 %v847_v26  ;;  %681 = vmatprep.subr.bf16.mxu1 %v745_v0 }
  0x24   :  { %598 = vmatprep.mubr.msk.f32.mxu0 %vm746_vm0, %v747_v4  ;;  %686 = vmatpush3.bf16.msra.mxu0 %v661_v29 }
  0x25   :  { %687 = vmatprep.subr.bf16.mxu0 %v745_v0 }
  0x26   :  { %683 = vmatpush3.bf16.msra.mxu1 %v682_v50 }
  0x27   :  { %708 = vmatprep.subr.bf16.mxu1 %v745_v0 }
  0x28   :  { %689 = vmatpush3.bf16.msra.mxu0 %v664_v32  ;;  %v408_v32 = vld [vmem:[%s993_s3] ss:$0 sm:$0xff] }
  0x29   :  { %690 = vmatprep.subr.bf16.mxu0 %v745_v0 }
  0x2c   :  { %692 = vmatpush3.bf16.msra.mxu0 %v667_v35 }
  0x2d   :  { %693 = vmatprep.subr.bf16.mxu0 %v745_v0 }
  0x30   :  { %695 = vmatpush3.bf16.msra.mxu0 %v670_v38 }
  0x31   :  { %696 = vmatprep.subr.bf16.mxu0 %v745_v0 }
  0x34   :  { %698 = vmatpush3.bf16.msra.mxu0 %v673_v41 }
  0x35   :  { %699 = vmatprep.subr.bf16.mxu0 %v745_v0 }
  0x38   :  { %701 = vmatpush3.bf16.msra.mxu0 %v676_v44 }
  0x39   :  { %702 = vmatprep.subr.bf16.mxu0 %v745_v0 }
  0x3c   :  { %704 = vmatpush3.bf16.msra.mxu0 %v679_v47 }
  0x3d   :  { %705 = vmatprep.subr.bf16.mxu0 %v745_v0 }
  0x40   :  { %707 = vmatpush3.bf16.msra.mxu0 %v682_v50 }
  0xf6   :  { %v129_v52 = vpop.f32.mrb[0].mxu0 }
  0xf7   :  { %v130_v53 = vadd.f32 %v407_v51, %v129_v52  ;;  %v530_v54 = vpop.f32.mrb[1].mxu0 }
  0xf9   :  { %v133_v55 = vsub.f32 0.0, %v130_v53 }
  0xfb   :  { %v134_v56 = vmul.f32 1.442695, %v133_v55 }
  0xfd   :  { %735 = vpow2.f32 %v134_v56 }
 0x107   :  { %v736_v57 = vpop.eup %735 }
 0x108   :  { %v136_v58 = vadd.f32 1.0, %v736_v57 }
 0x10a   :  { %737 = vrcp.f32 %v136_v58 }
 0x114   :  { %v738_v59 = vpop.eup %737 }
 0x115   :  { %v138_v60 = vadd.f32 %v738_v59, %v847_v26  ;;  %v730_v26 = vpack.c.bf16 %v425_v25, %v424_v24 }
 0x117   :  { %564 = vmatmul.mubr.f32.vlgmr.msra.gmra.mrb[0].mxu1 %v138_v60 }
 0x118   :  { %633 = vmatprep.mubr.msk.f32.mxu1 %vm746_vm0, %v747_v4  ;;  %710 = vmatpush3.bf16.msra.mxu1 %v709_v1  ;;  %v414_v4 = vld [vmem:[%s989_s1 + $0xa0] sm:$0xff] }
 0x119   :  { %711 = vmatprep.subr.bf16.mxu1 %v745_v0  ;;  %v715_v6 = vpack.c.bf16 %v415_v5, %v414_v4 }
 0x11c   :  { %713 = vmatpush3.bf16.msra.mxu1 %v712_v3 }
 0x11d   :  { %714 = vmatprep.subr.bf16.mxu1 %v745_v0 }
 0x120   :  { %716 = vmatpush3.bf16.msra.mxu1 %v715_v6 }
 0x121   :  { %717 = vmatprep.subr.bf16.mxu1 %v745_v0 }
 0x124   :  { %719 = vmatpush3.bf16.msra.mxu1 %v718_v14 }
 0x125   :  { %720 = vmatprep.subr.bf16.mxu1 %v745_v0 }
 0x128   :  { %722 = vmatpush3.bf16.msra.mxu1 %v721_v17 }
 0x129   :  { %723 = vmatprep.subr.bf16.mxu1 %v745_v0 }
 0x12c   :  { %725 = vmatpush3.bf16.msra.mxu1 %v724_v20 }
 0x12d   :  { %726 = vmatprep.subr.bf16.mxu1 %v745_v0 }
 0x130   :  { %728 = vmatpush3.bf16.msra.mxu1 %v727_v23 }
 0x131   :  { %729 = vmatprep.subr.bf16.mxu1 %v745_v0  ;;  %v427_v0 = vld [vmem:[%s992_s2 + $0x1] ss:$0 sm:$0xff] }
 0x134   :  { %731 = vmatpush3.bf16.msra.mxu1 %v730_v26 }
 0x1ea   :  { %v205_v7 = vpop.f32.mrb[0].mxu1 }
 0x1eb   :  { %v209_v8 = vmul.f32 0.03125, %v205_v7  ;;  %v565_v9 = vpop.f32.mrb[1].mxu1 }
 0x1ed   :  { %v210_v10 = vsub.f32 %v138_v60, %v209_v8 }
 0x1ef   :  { %v211_v11 = vmul.f32 %v210_v10, %v210_v10 }
 0x1f1   :  { %599 = vmatmul.mubr.f32.vlgmr.msra.gmra.mrb[2].mxu0 %v211_v11 }
 0x2c4   :  { %v278_v27 = vpop.f32.mrb[2].mxu0 }
 0x2c5   :  { %v282_v28 = vmul.f32 0.03125, %v278_v27  ;;  %v600_v29 = vpop.f32.mrb[3].mxu0 }
 0x2c7   :  { %v283_v30 = vadd.f32 1e-05, %v282_v28 }
 0x2c9   :  { %739 = vrsqrt.f32 %v283_v30 }
 0x2d3   :  { %v740_v31 = vpop.eup %739 }
 0x2d4   :  { %v285_v33 = vmul.f32 %v740_v31, %v210_v10 }
 0x2d6   :  { %v293_v35 = vmul.f32 %v408_v32, %v285_v33 }
 0x2d8   :  { %v301_v36 = vadd.f32 %v409_v34, %v293_v35 }
 0x2da   :  { %634 = vmatmul.mubr.f32.vlgmr.msra.gmra.mrb[2].mxu1 %v301_v36 }
 0x3ad   :  { %v393_v37 = vpop.f32.mrb[2].mxu1 }
 0x3ae   :  { %v394_v38 = vadd.f32 %v427_v0, %v393_v37  ;;  %v635_v39 = vpop.f32.mrb[3].mxu1 }
 0x3b0   :  { %v397_v40 = vsub.f32 0.0, %v394_v38 }
 0x3b2   :  { %v398_v41 = vmul.f32 1.442695, %v397_v40 }
 0x3b4   :  { %741 = vpow2.f32 %v398_v41 }
 0x3be   :  { %v742_v42 = vpop.eup %741 }
 0x3bf   :  { %v400_v43 = vadd.f32 1.0, %v742_v42 }
 0x3c1   :  { %743 = vrcp.f32 %v400_v43 }
 0x3cb   :  { %v744_v44 = vpop.eup %743 }
 0x3cc   :  { %402 = vst [vmem:[%s995_s6] sm:$0xff] %v744_v44 }

</bundles_post_ra>
